<compile_context>
chip_gen: v5e
topology: v5e:2x2
jax: 0.10.0
libtpu: 0.0.40
codegen_flags: <defaults>
</compile_context>

<pallas_src>
import functools

import jax
import jax.numpy as jnp
from jax.experimental import pallas as pl
from jax.experimental.pallas import tpu as pltpu


def _affine_kernel(lr_scale, scale_ref, bias_ref, cb_ref, out_ref):
    # scale_ref/bias_ref: (1, 1, L) raw parameters for this group (VMEM-resident
    #                     across all row tiles of the group).
    # cb_ref/out_ref:     (1, TR, L) row tile of this group's codebook.
    scale = 1.0 + lr_scale * scale_ref[...].astype(jnp.float32)   # get_affine_params()
    bias = lr_scale * bias_ref[...].astype(jnp.float32)
    out_ref[...] = (scale * cb_ref[...].astype(jnp.float32)
                    + bias).astype(out_ref.dtype)                 # broadcast over rows


def affine_transform(codebook, scale_param, bias_param, *, lr_scale=1.0,
                     num_groups=1):
    """Equivalent of AffineTransform.forward (use_running_statistics=False).

    lr_scale must be a static Python scalar (it is a plain attribute in the
    PyTorch module, not a learned tensor).
    """
    n, c = codebook.shape
    assert n % num_groups == 0
    rows = n // num_groups

    # ---- Lane-dense repack when feature_size < 128 and divides 128. --------
    if c < 128 and 128 % c == 0 and (rows * c) % 128 == 0:
        lane = 128
        reps = 128 // c
        view_rows = (rows * c) // 128
        cb3 = codebook.reshape(num_groups, view_rows, lane)
        # lane l of the packed layout corresponds to feature l % c.
        scale3 = jnp.tile(scale_param.reshape(num_groups, 1, c), (1, 1, reps))
        bias3 = jnp.tile(bias_param.reshape(num_groups, 1, c), (1, 1, reps))
    else:
        lane = c
        view_rows = rows
        cb3 = codebook.reshape(num_groups, view_rows, lane)
        scale3 = scale_param.reshape(num_groups, 1, c)
        bias3 = bias_param.reshape(num_groups, 1, c)

    # ---- Row-tile selection: ~1 MiB per tile (double-buffered in+out stays
    # well under the scoped VMEM limit on v5e/v6e/v7x). ----------------------
    dtype_bytes = jnp.dtype(codebook.dtype).itemsize
    sub_mult = {4: 8, 2: 16, 1: 32}.get(dtype_bytes, 8)
    target_bytes = 1 << 20
    tr = max(sub_mult,
             (target_bytes // max(1, lane * dtype_bytes)) // sub_mult * sub_mult)
    if view_rows <= tr:
        tr = view_rows                     # single full-extent block: always legal
    n_row_tiles = pl.cdiv(view_rows, tr)   # partial last tile handled by Pallas

    kernel = functools.partial(_affine_kernel, float(lr_scale))
    out3 = pl.pallas_call(
        kernel,
        out_shape=jax.ShapeDtypeStruct((num_groups, view_rows, lane),
                                       codebook.dtype),
        grid_spec=pl.GridSpec(
            grid=(num_groups, n_row_tiles),
            in_specs=[
                pl.BlockSpec((1, 1, lane), lambda g, r: (g, 0, 0)),    # scale
                pl.BlockSpec((1, 1, lane), lambda g, r: (g, 0, 0)),    # bias
                pl.BlockSpec((1, tr, lane), lambda g, r: (g, r, 0)),   # codebook
            ],
            out_specs=pl.BlockSpec((1, tr, lane), lambda g, r: (g, r, 0)),
        ),
        compiler_params=pltpu.CompilerParams(
            dimension_semantics=("parallel", "parallel")),
    )(scale3, bias3, cb3)
    return out3.reshape(n, c)


# TODO(synk): use_running_statistics=True branch (EMA running-buffer updates +
# sqrt(var ratio) parameterization) is training-time buffer bookkeeping; only
# the learned (scale, bias) forward branch is implemented here.


if __name__ == "__main__":
    # Shapes consistent with the module: codebook (n, feature_size),
    # params (num_groups, feature_size).
    n = 16
    feature_size = 32
    num_groups = 2
    lr_scale = 1.0

    key = jax.random.PRNGKey(0)
    k_cb, k_s, k_b = jax.random.split(key, 3)
    codebook = jax.random.normal(k_cb, (n, feature_size), dtype=jnp.float32)
    # nn.Parameter(torch.zeros(...)) -> zeros init; add a small deterministic
    # perturbation so the affine is non-trivial.
    scale_param = jnp.zeros((num_groups, feature_size), jnp.float32) \
        + 0.1 * jax.random.normal(k_s, (num_groups, feature_size), jnp.float32)
    bias_param = jnp.zeros((num_groups, feature_size), jnp.float32) \
        + 0.1 * jax.random.normal(k_b, (num_groups, feature_size), jnp.float32)

    out = affine_transform(codebook, scale_param, bias_param,
                           lr_scale=lr_scale, num_groups=num_groups)
    out = jax.block_until_ready(out)

    # Reference (plain JAX) check of the forward semantics.
    scale = (1.0 + lr_scale * scale_param)[:, None, :]
    bias = (lr_scale * bias_param)[:, None, :]
    ref = (scale * codebook.reshape(num_groups, -1, feature_size)
           + bias).reshape(n, feature_size)
    assert out.shape == (n, feature_size)
    assert jnp.allclose(out, ref, atol=1e-6, rtol=1e-6)

    print("KERNEL_OK")
</pallas_src>

<mosaic_0001>
module attributes {stable_mosaic.version = 11 : i64} {
  func.func @_affine_kernel(%arg0: i32, %arg1: i32, %arg2: memref<1x1x128xf32, #tpu.memory_space<vmem>>, %arg3: memref<1x1x128xf32, #tpu.memory_space<vmem>>, %arg4: memref<1x2x128xf32, #tpu.memory_space<vmem>>, %arg5: memref<1x2x128xf32, #tpu.memory_space<vmem>>) attributes {dimension_semantics = [#tpu.dimension_semantics<parallel>, #tpu.dimension_semantics<parallel>], iteration_bounds = array<i64: 2, 1>, scalar_prefetch = 0 : i64, scratch_operands = 0 : i64, tpu.core_type = #tpu.core_type<tc>, window_params = [{transform_indices = @transform_0, window_bounds = array<i64: 1, 1, 128>}, {transform_indices = @transform_1, window_bounds = array<i64: 1, 1, 128>}, {transform_indices = @transform_2, window_bounds = array<i64: 1, 2, 128>}, {transform_indices = @transform_3, window_bounds = array<i64: 1, 2, 128>}]} {
    %c0 = arith.constant 0 : index
    %c0_0 = arith.constant 0 : index
    %c0_1 = arith.constant 0 : index
    %0 = vector.load %arg2[%c0, %c0_0, %c0_1] : memref<1x1x128xf32, #tpu.memory_space<vmem>>, vector<1x1x128xf32>
    %cst = arith.constant 1.000000e+00 : f32
    %1 = vector.broadcast %cst : f32 to vector<1x1x128xf32>
    %2 = arith.mulf %1, %0 : vector<1x1x128xf32>
    %cst_2 = arith.constant 1.000000e+00 : f32
    %3 = vector.broadcast %cst_2 : f32 to vector<1x1x128xf32>
    %4 = arith.addf %3, %2 : vector<1x1x128xf32>
    %c0_3 = arith.constant 0 : index
    %c0_4 = arith.constant 0 : index
    %c0_5 = arith.constant 0 : index
    %5 = vector.load %arg3[%c0_3, %c0_4, %c0_5] : memref<1x1x128xf32, #tpu.memory_space<vmem>>, vector<1x1x128xf32>
    %cst_6 = arith.constant 1.000000e+00 : f32
    %6 = vector.broadcast %cst_6 : f32 to vector<1x1x128xf32>
    %7 = arith.mulf %6, %5 : vector<1x1x128xf32>
    %c0_7 = arith.constant 0 : index
    %c0_8 = arith.constant 0 : index
    %c0_9 = arith.constant 0 : index
    %8 = vector.load %arg4[%c0_7, %c0_8, %c0_9] : memref<1x2x128xf32, #tpu.memory_space<vmem>>, vector<1x2x128xf32>
    %9 = vector.broadcast %4 : vector<1x1x128xf32> to vector<1x2x128xf32>
    %10 = arith.mulf %9, %8 : vector<1x2x128xf32>
    %11 = vector.broadcast %7 : vector<1x1x128xf32> to vector<1x2x128xf32>
    %12 = arith.addf %10, %11 : vector<1x2x128xf32>
    %c0_10 = arith.constant 0 : index
    %c0_11 = arith.constant 0 : index
    %c0_12 = arith.constant 0 : index
    %13 = vector.load %arg5[%c0_10, %c0_11, %c0_12] : memref<1x2x128xf32, #tpu.memory_space<vmem>>, vector<1x2x128xf32>
    tpu.vector_store %arg5[%c0_10, %c0_11, %c0_12], %12 {strides = array<i32>} : memref<1x2x128xf32, #tpu.memory_space<vmem>>, vector<1x2x128xf32>,
    return
  }
  func.func @transform_0(%arg0: i32, %arg1: i32) -> (i32, i32, i32) {
    %c0_i32 = arith.constant 0 : i32
    %c0_i32_0 = arith.constant 0 : i32
    %c0_i32_1 = arith.constant 0 : i32
    return %arg0, %c0_i32, %c0_i32_0 : i32, i32, i32
  }
  func.func @transform_1(%arg0: i32, %arg1: i32) -> (i32, i32, i32) {
    %c0_i32 = arith.constant 0 : i32
    %c0_i32_0 = arith.constant 0 : i32
    %c0_i32_1 = arith.constant 0 : i32
    return %arg0, %c0_i32, %c0_i32_0 : i32, i32, i32
  }
  func.func @transform_2(%arg0: i32, %arg1: i32) -> (i32, i32, i32) {
    %c0_i32 = arith.constant 0 : i32
    %c0_i32_0 = arith.constant 0 : i32
    return %arg0, %arg1, %c0_i32 : i32, i32, i32
  }
  func.func @transform_3(%arg0: i32, %arg1: i32) -> (i32, i32, i32) {
    %c0_i32 = arith.constant 0 : i32
    %c0_i32_0 = arith.constant 0 : i32
    return %arg0, %arg1, %c0_i32 : i32, i32, i32
  }
}

</mosaic_0001>

<bundles_post_ra>
// kernel: tpu_custom_call.1
= control target key start
LH: loop header
LB: loop body
LE: loop exit
PB: predicated region body
PF: predicated region fallthrough
CT: control target
= control target key end

     0   :  { %s857_s0 = inlined_call_operand.hbm [shape: f32[2,1,128], index: 0, kind: input, shape index: {}]   ;;  %s858_s1 = inlined_call_operand.hbm [shape: f32[2,1,128], index: 1, kind: input, shape index: {}]   ;;  %s859_s2 = inlined_call_operand.hbm [shape: f32[2,2,128], index: 2, kind: input, shape index: {}]   ;;  %s860_s3 = inlined_call_operand.hbm [shape: f32[2,2,128], index: 3, kind: output, shape index: {}]  }
   0x1   :  { %863 = sst [smem:[#allocation15_spill]] %s858_s1 }
   0x2   :  { %8 = vsyncpa [#allocation3], 0 }
   0x3   :  { %10 = vsyncpa [#allocation3 + $0x1], 0 }
   0x4   :  { %11 = vsyncpa [#allocation6], 0 }
   0x5   :  { %13 = vsyncpa [#allocation6 + $0x1], 0 }
   0x6   :  { %14 = vsyncpa [#allocation4], 0 }
   0x7   :  { %16 = vsyncpa [#allocation4 + $0x1], 0  ;;  %s701_s12 = smov 0   ;;  %s703_s13 = smov 0  }
   0x8   :  { %s705_s14 = smov 0   ;;  %s707_s15 = smov 0  }
   0x9   :  { %s709_s16 = smov 0   ;;  %s711_s17 = smov 0  }
   0xa LB: > { %864 = sst [smem:[#allocation12_spill]] %s667_s14  ;;  %s732_s18 = sadd.s32 4294967295, %s679_s17   ;;  %s679_s17 = sphi %s711_s17, %s22_s17   ;;  %s675_s16 = sphi %s709_s16, %s880_s16   ;;  %s671_s15 = sphi %s707_s15, %s879_s15   ;;  %s667_s14 = sphi %s705_s14, %s875_s14   ;;  %s663_s13 = sphi %s703_s13, %s878_s13   ;;  %s659_s12 = sphi %s701_s12, %s877_s12  }
   0xb   : > { %s418_s19 = sadd.s32 4294967294, %s679_s17   ;;  %s34_s20 = sadd.s32 1, %s675_s16 }
   0xc   : > { %s41_s21 = sadd.s32 1, %s667_s14  ;;  %p36_p0 = scmp.ge.s32.totalorder %s34_s20, 2 }
   0xd   : > { %p48_p1 = scmp.ne.s32.totalorder %s667_s14, %s663_s13  ;;  %p49_p2 = scmp.eq.s32.totalorder %s679_s17, 0 }
   0xe   : > { %p54_p3 = scmp.ne.s32.totalorder %s663_s13, %s659_s12  ;;  %s882_s20 = smov (%p36_p0, %s34_s20), 0 }
   0xf   : > { %865 = sst [smem:[#allocation13_spill]] %s882_s20  ;;  %p744_p4 = por %p49_p2, %p48_p1 }
  0x10   : > { %p55_p5 = scmp.eq.s32.totalorder %s732_s18, 0  ;;  %s38_s23 = ssub.s32 %s675_s16, %s882_s20 }
  0x11   : > { %p134_p6 = scmp.eq.s32.totalorder %s732_s18, 1  ;;  %p39_p7 = scmp.eq.s32.totalorder %s38_s23, 0 }
  0x12   : > { %p752_p8 = por %p55_p5, %p54_p3  ;;  %p140_p10 = scmp.eq.s32.totalorder %s418_s19, 1 }
  0x13   : > { %p756_p9 = por %p134_p6, %p48_p1  ;;  %p420_p12 = scmp.ge.s32.totalorder %s679_s17, 2 }
  0x14   : > { %s761_s26 = scalar_select %p39_p7, %s667_s14, %s41_s21  }
  0x15   : > { %p763_p11 = por %p140_p10, %p54_p3  ;;  %p452_p13 = scmp.lt.s32.totalorder %s679_s17, 2 }
  0x16   : > { %869 = sst [smem:[#allocation14_spill]] %s761_s26  ;;  %s160_s28 = sand.u32 1, %s667_s14  }
  0x17   : > { %s177_s29 = sand.u32 1, %s679_s17   ;;  %p773_p0 = pnand %p452_p13, %p744_p4 }
  0x18   : > { %s872_s1 = sld [smem:[#allocation15_spill]]  ;;  %s180_s7 = scalar_lea.vmem [#allocation5], %s160_s28 }
  0x19   : > { %s187_s8 = sshll.u32 %s180_s7, 4  ;;  %s178_s10 = scalar_lea.sflag [#allocation6], %s177_s29  ;;  %s188_s8 = int_to_ptr.vmem [resolvable:$true] %s187_s8 }
  0x1a   : > { %p423_p1 = scmp.ge.s32.totalorder %s679_s17, 1  ;;  %p212_p2 = scmp.lt.s32.totalorder %s679_s17, 3 }
  0x1b   : > { %s166_s22 = scalar_lea.hbm %s857_s0, %s675_s16  ;;  %s163_s4 = scalar_lea.vmem [#allocation2], %s160_s28 }
  0x1c   : > { %p785_p3 = pnand %p423_p1, %p212_p2  ;;  %s168_s23 = sshll.u32 %s166_s22, 4  ;;  %s169_s23 = int_to_ptr.hbm [resolvable:$true] %s168_s23 }
  0x1d   : > { %s170_s5 = sshll.u32 %s163_s4, 4  ;;  %s421_s29 = sshll.u32 %s160_s28, 1  ;;  %s171_s5 = int_to_ptr.vmem [resolvable:$true] %s170_s5 }
  0x1e   : > { %s183_s6 = scalar_lea.hbm %s872_s1, %s675_s16  ;;  %s422_s7 = sshll.u32 %s675_s16, 1 }
  0x1f   : > { %s185_s9 = sshll.u32 %s183_s6, 4  ;;  %s161_s6 = scalar_lea.sflag [#allocation3], %s160_s28  ;;  %s186_s9 = int_to_ptr.hbm [resolvable:$true] %s185_s9 }
  0x20   : > { %444 = dma.hbm_to_vmem [thread:$0]  (!%p773_p0), %s186_s9, 16, %s188_s8, %s178_s10  }
  0x21   : > { %441 = dma.hbm_to_vmem [thread:$0]  (!%p773_p0), %s169_s23, 16, %s171_s5, %s161_s6  }
  0x22   : > { %s203_s1 = scalar_lea.hbm %s859_s2, %s422_s7  ;;  %s198_s26 = scalar_lea.vmem [#allocation7], %s421_s29 }
  0x23   : > { %s205_s20 = sshll.u32 %s203_s1, 4  ;;  %s207_s14 = sshll.u32 %s198_s26, 4  ;;  %s206_s20 = int_to_ptr.hbm [resolvable:$true] %s205_s20  ;;  %s208_s14 = int_to_ptr.vmem [resolvable:$true] %s207_s14 }
  0x24   : > { %447 = dma.hbm_to_vmem [thread:$0]  (!%p773_p0), %s206_s20, 32, %s208_s14, %s178_s10  }
  0x25   : > { %216 = sbr.rel (%p785_p3) target bundleno = 62 (0x3e), region = 32  ;;  %s804_s19 = sand.u32 (!%p785_p3), 1, %s663_s13  }
  0x26   : > { %s219_s28 = scalar_lea.sflag (!%p785_p3), [#allocation3], %s804_s19  ;;  %s221_s21 = scalar_lea.vmem (!%p785_p3), [#allocation2], %s804_s19 }
  0x2a   : > { %646 = dma.done.wait (%p752_p8), %s219_s28, 16  }
  0x2b   : > { %648 = vsyncadd (%p752_p8), %s219_s28, 4294967280  ;;  %s227_s1 = sand.u32 1, %s732_s18   ;;  %s230_s20 = scalar_lea.vmem [#allocation5], %s804_s19 }
  0x2c   : > { %s228_s14 = scalar_lea.sflag [#allocation6], %s227_s1 }
  0x2d   : > { %650 = dma.done.wait (%p752_p8), %s228_s14, 48  }
  0x2e   : > { %652 = vsyncadd (%p752_p8), %s228_s14, 4294967248  ;;  %s424_s26 = sshll.u32 %s804_s19, 1  ;;  %s427_s30 = sshll.u32 %s671_s15, 1  ;;  %v272_v0 = vld [vmem:[%s221_s21] sm:$0x1] }
  0x2f   : > { %v273_v1 = vadd.f32 1.0, %v272_v0  ;;  %s297_s22 = scalar_lea.hbm %s860_s3, %s427_s30  ;;  %s240_s23 = scalar_lea.vmem [#allocation7], %s424_s26  ;;  %v502_v4 = vld [vmem:[%s230_s20] ss:$0 sm:$0xff] }
  0x30   : > { %v275_v2 = vld [vmem:[%s240_s23] sm:$0x3]  ;;  %s271_s18 = scalar_lea.vmem [#allocation8], %s424_s26  ;;  %s301_s24 = sshll.u32 %s297_s22, 4  ;;  %s302_s24 = int_to_ptr.hbm [resolvable:$true] %s301_s24 }
  0x31   : > { %v277_v3 = vperm.slane %v273_v1, 0  ;;  %s299_s4 = sshll.u32 %s271_s18, 4  ;;  %s286_s15 = scalar_lea.sflag [#allocation4], %s804_s19  ;;  %s300_s4 = int_to_ptr.vmem [resolvable:$true] %s299_s4 }
  0x32   : > { %s607_s5 = sshra.s32 %s302_s24, 4  ;;  %s613_s8 = scalar_lea.hbm %s860_s3, 4  ;;  %s608_s5 = int_to_ptr.hbm [resolvable:$true] %s607_s5 }
  0x33   : > { %v279_v5 = vmul.f32 %v277_v3, %v275_v2  ;;  %s609_s6 = scalar_lea.hbm %s608_s5, 2  ;;  %p614_p7 = scmp.lt.s32.totalorder %s608_s5, %s860_s3 }
  0x34   : > { %p610_p4 = scmp.ne.s32.totalorder %s608_s5, %s609_s6  ;;  %p615_p8 = scmp.lt.s32.totalorder %s613_s8, %s609_s6 }
  0x35   : > { %v283_v6 = vadd.f32 %v502_v4, %v279_v5 }
  0x36   : > { %p611_p5 = pnand %p610_p4, %p756_p9  ;;  %p616_p10 = por %p615_p8, %p614_p7 }
  0x37   : > { %284 = vst [vmem:[%s271_s18] sm:$0x3] %v283_v6 }
  0x38   : > { %p612_p6 = pneg %p611_p5 }
  0x3a   : > { %p617_p13 = pnand %p616_p10, %p612_p6 }
  0x3c   : > { %620 = shalt.err (!%p617_p13)
}
  0x3d   : > { %436 = dma.vmem_to_hbm [thread:$0]  (%p756_p9), %s300_s4, 32, %s302_s24, %s286_s15  }
  0x3e PF: > { %s313_s19 = sand.u32 1, %s659_s12   ;;  %p449_p0 = pnand %p420_p12, %p763_p11 }
  0x3f   : > { %s314_s21 = scalar_lea.sflag [#allocation4], %s313_s19 }
  0x40   : > { %p450_p1 = pneg %p449_p0 }
  0x42   : > { %654 = dma.done.wait (%p450_p1), %s314_s21, 32  }
  0x43   : > { %656 = vsyncadd (%p450_p1), %s314_s21, 4294967264  ;;  %s22_s17 = sadd.s32 1, %s679_s17   ;;  %s874_s1 = sld [smem:[#allocation12_spill]] }
  0x44   : > { %p19_p2 = scmp.ge.s32.totalorder %s22_s17, 4   ;;  %s875_s14 = sld [smem:[#allocation14_spill]] }
  0x45   : > { %s876_s25 = sld [smem:[#allocation13_spill]]  ;;  %s877_s12 = smov %s663_s13 }
  0x46   : > { %s879_s15 = smov %s675_s16 }
  0x47   :  { %21 = sbr.rel (!%p19_p2) target bundleno = 10 (0xa), region = 101 }
  0x49   : > { %s878_s13 = smov %s874_s1 }
  0x4b   : > { %s880_s16 = smov %s876_s25 }
  0x4c   :  { %320 = vsyncpa [#allocation3], 1 }
  0x4d   :  { %322 = vsyncpa [#allocation3 + $0x1], 1 }
  0x4e   :  { %323 = vsyncpa [#allocation6], 1 }
  0x4f   :  { %325 = vsyncpa [#allocation6 + $0x1], 1 }
  0x50   :  { %326 = vsyncpa [#allocation4], 1 }
  0x51   :  { %328 = vsyncpa [#allocation4 + $0x1], 1 }

</bundles_post_ra>
